<compile_context>
chip_gen: v5e
topology: v5e:2x2
jax: 0.10.0
libtpu: 0.0.40
codegen_flags: <defaults>
</compile_context>

<pallas_src>
import math

import jax
import jax.numpy as jnp
from jax.experimental import pallas as pl
from jax.experimental.pallas import tpu as pltpu

# ---------------- small BERT config ----------------
VOCAB = 128
TYPE_VOCAB = 2
MAX_POS = 32
HIDDEN = 32
NUM_HEADS = 2
HEAD_DIM = HIDDEN // NUM_HEADS
INTERMEDIATE = 64
NUM_LAYERS = 2
LN_EPS = 1e-12


# ---------------- in-kernel helpers ----------------
def _layernorm(h, g, b):
    # f32 VPU math (v5e has no bf16 VALU)
    mu = jnp.mean(h, axis=-1, keepdims=True)
    c = h - mu
    var = jnp.mean(c * c, axis=-1, keepdims=True)
    return c * jax.lax.rsqrt(var + LN_EPS) * g + b


def _mm(x_f32, w_bf16):
    # bf16 MXU inputs, f32 accumulation
    return jnp.dot(x_f32.astype(jnp.bfloat16), w_bf16,
                   preferred_element_type=jnp.float32)


# ---------------- fused encoder-layer kernel ----------------
def _encoder_layer_kernel(emb_ref, mb_ref, eg_ref, eb_ref,
                          wqkv_ref, bqkv_ref, wo_ref, bo_ref,
                          ln1g_ref, ln1b_ref, w1_ref, b1_ref,
                          w2_ref, b2_ref, ln2g_ref, ln2b_ref,
                          out_ref, x_ref, ctx_ref):
    """One (batch-tile, layer) grid step of the BERT encoder.

    grid = (B, NUM_LAYERS); batch axis "parallel" (megacore on v7x), layer axis
    "arbitrary" (carried).  The activation lives in x_ref (VMEM scratch) across
    the layer axis; per-layer weights are streamed one layer at a time so the
    next layer's weight DMA overlaps this layer's compute.
    """
    l = pl.program_id(1)
    S, H = x_ref.shape
    nH = NUM_HEADS
    d = H // nH
    scale = 1.0 / math.sqrt(d)

    # ---- l == 0: embedding LayerNorm initializes the resident activation ----
    @pl.when(l == 0)
    def _():
        e = emb_ref[0].astype(jnp.float32)                       # (S, H)
        x_ref[...] = _layernorm(e, eg_ref[...], eb_ref[...])

    x = x_ref[...]                                               # f32 (S, H)

    # mask-bias broadcast hoisted out of the head loop (JAX does not CSE it)
    mbias = jnp.broadcast_to(mb_ref[0], (S, S))                  # f32 (S, S)

    # ---- fused QKV projection: one [H, 3H] MXU push per layer ----
    qkv = _mm(x, wqkv_ref[0]) + bqkv_ref[0]                      # f32 (S, 3H)

    # ---- multi-head attention ----
    # TODO(synk): at real BERT sizes batch the heads into a single leading-dim
    # einsum (or a head grid axis) instead of a Python loop over d-wide lane
    # slices; kept as a tiny static loop here for lowering robustness.
    for h in range(nH):
        qh = qkv[:, h * d:(h + 1) * d]
        kh = qkv[:, H + h * d:H + (h + 1) * d]
        vh = qkv[:, 2 * H + h * d:2 * H + (h + 1) * d]

        s = jnp.einsum('qd,kd->qk',
                       qh.astype(jnp.bfloat16), kh.astype(jnp.bfloat16),
                       preferred_element_type=jnp.float32) * scale + mbias
        m = jnp.max(s, axis=-1, keepdims=True)
        p = jnp.exp(s - m)
        p = p * pl.reciprocal(jnp.sum(p, axis=-1, keepdims=True), approx=True)

        # each head's context goes into its lane slice of the ctx slab
        ctx_ref[:, h * d:(h + 1) * d] = jnp.einsum(
            'qk,kd->qd', p.astype(jnp.bfloat16), vh.astype(jnp.bfloat16),
            preferred_element_type=jnp.float32)

    # ONE K=H output projection (instead of nH K=head_dim MXU pushes)
    attn = _mm(ctx_ref[...], wo_ref[0]) + bo_ref[0]
    # fused residual add + LayerNorm epilogue
    x = _layernorm(attn + x, ln1g_ref[0], ln1b_ref[0])

    # ---- FFN ----
    h1 = _mm(x, w1_ref[0]) + b1_ref[0]                           # f32 (S, I)
    # TODO(synk): HF BERT uses exact erf-GELU; tanh-approx GELU is used here
    # (erf is not guaranteed to lower through Mosaic).
    h1 = 0.5 * h1 * (1.0 + jnp.tanh(
        0.7978845608028654 * (h1 + 0.044715 * h1 * h1 * h1)))
    h2 = _mm(h1, w2_ref[0]) + b2_ref[0]                          # f32 (S, H)
    x = _layernorm(h2 + x, ln2g_ref[0], ln2b_ref[0])

    x_ref[...] = x

    # ---- last layer: emit result ----
    # NOTE: real BERT has H=768 (multiple of 128) -> lane-dense store; toy H=32
    # is a masked store, left as-is.
    @pl.when(l == pl.num_programs(1) - 1)
    def _():
        out_ref[0] = x


# ---------------- BERT encoder forward ----------------
def bert_encoder_forward(packed, word, mask, seg):
    B, S = word.shape
    H, I, L = HIDDEN, INTERMEDIATE, NUM_LAYERS

    # embedding gather is glue (data-dependent lookup stays in JAX)
    # TODO(synk): fuse the gather via scalar-prefetch + pl.Element row indexing
    # to remove one HBM round-trip of the activation.
    emb = (packed["word_emb"][word]
           + packed["pos_emb"][:S][None, :, :]
           + packed["type_emb"][seg]).astype(jnp.bfloat16)        # (B, S, H)

    # HF-style extended attention mask, broadcast over query positions
    mask_bias = ((1.0 - mask.astype(jnp.float32)) * -10000.0).reshape(B, 1, S)

    batch_map3 = lambda b, l: (b, 0, 0)     # activation / mask / output blocks
    layer_map3 = lambda b, l: (l, 0, 0)     # per-layer streamed weights
    const_map2 = lambda b, l: (0, 0)        # embedding LN params

    in_specs = [
        pl.BlockSpec((1, S, H), batch_map3),       # emb (bf16)
        pl.BlockSpec((1, 1, S), batch_map3),       # mask bias
        pl.BlockSpec((1, H), const_map2),          # emb LN gamma
        pl.BlockSpec((1, H), const_map2),          # emb LN beta
        pl.BlockSpec((1, H, 3 * H), layer_map3),   # wqkv
        pl.BlockSpec((1, 1, 3 * H), layer_map3),   # bqkv
        pl.BlockSpec((1, H, H), layer_map3),       # wo
        pl.BlockSpec((1, 1, H), layer_map3),       # bo
        pl.BlockSpec((1, 1, H), layer_map3),       # ln1 gamma
        pl.BlockSpec((1, 1, H), layer_map3),       # ln1 beta
        pl.BlockSpec((1, H, I), layer_map3),       # w1
        pl.BlockSpec((1, 1, I), layer_map3),       # b1
        pl.BlockSpec((1, I, H), layer_map3),       # w2
        pl.BlockSpec((1, 1, H), layer_map3),       # b2
        pl.BlockSpec((1, 1, H), layer_map3),       # ln2 gamma
        pl.BlockSpec((1, 1, H), layer_map3),       # ln2 beta
    ]

    out = pl.pallas_call(
        _encoder_layer_kernel,
        out_shape=jax.ShapeDtypeStruct((B, S, H), jnp.float32),
        grid_spec=pltpu.PrefetchScalarGridSpec(
            num_scalar_prefetch=0,
            grid=(B, L),                              # (batch tile, layer)
            in_specs=in_specs,
            out_specs=pl.BlockSpec((1, S, H), batch_map3),
            scratch_shapes=[
                pltpu.VMEM((S, H), jnp.float32),      # resident activation
                pltpu.VMEM((S, H), jnp.float32),      # ctx head slab
            ]),
        compiler_params=pltpu.CompilerParams(
            dimension_semantics=("parallel", "arbitrary"),
            vmem_limit_bytes=32 * 1024 * 1024),       # explicit budget, safe on v5e/v6e/v7x
    )(emb, mask_bias,
      packed["emb_ln_g"], packed["emb_ln_b"],
      packed["wqkv"], packed["bqkv"], packed["wo"], packed["bo"],
      packed["ln1_g"], packed["ln1_b"], packed["w1"], packed["b1"],
      packed["w2"], packed["b2"], packed["ln2_g"], packed["ln2_b"])
    return out


# ---------------- deterministic parameter init ----------------
def init_params(key):
    def nrm(k, shape):
        return 0.02 * jax.random.normal(k, shape, jnp.float32)

    keys = jax.random.split(key, 4 + NUM_LAYERS)
    params = {
        "word_emb": nrm(keys[0], (VOCAB, HIDDEN)),
        "pos_emb": nrm(keys[1], (MAX_POS, HIDDEN)),
        "type_emb": nrm(keys[2], (TYPE_VOCAB, HIDDEN)),
        "emb_ln_g": jnp.ones((HIDDEN,), jnp.float32),
        "emb_ln_b": jnp.zeros((HIDDEN,), jnp.float32),
        "layers": [],
    }
    for l in range(NUM_LAYERS):
        lk = jax.random.split(keys[4 + l], 6)
        params["layers"].append({
            "wq": nrm(lk[0], (HIDDEN, HIDDEN)), "bq": jnp.zeros((HIDDEN,), jnp.float32),
            "wk": nrm(lk[1], (HIDDEN, HIDDEN)), "bk": jnp.zeros((HIDDEN,), jnp.float32),
            "wv": nrm(lk[2], (HIDDEN, HIDDEN)), "bv": jnp.zeros((HIDDEN,), jnp.float32),
            "wo": nrm(lk[3], (HIDDEN, HIDDEN)), "bo": jnp.zeros((HIDDEN,), jnp.float32),
            "ln1_g": jnp.ones((HIDDEN,), jnp.float32), "ln1_b": jnp.zeros((HIDDEN,), jnp.float32),
            "w1": nrm(lk[4], (HIDDEN, INTERMEDIATE)), "b1": jnp.zeros((INTERMEDIATE,), jnp.float32),
            "w2": nrm(lk[5], (INTERMEDIATE, HIDDEN)), "b2": jnp.zeros((HIDDEN,), jnp.float32),
            "ln2_g": jnp.ones((HIDDEN,), jnp.float32), "ln2_b": jnp.zeros((HIDDEN,), jnp.float32),
        })
    return params


def pack_params(params):
    """Stack per-layer weights along a leading L axis; fuse QKV; bf16 matmul weights."""
    layers = params["layers"]

    def stack_mat(name):   # MXU weights -> bf16
        return jnp.stack([lp[name] for lp in layers]).astype(jnp.bfloat16)

    def stack_vec(name):   # biases / LN params -> f32, shaped [L, 1, N]
        return jnp.stack([lp[name][None, :] for lp in layers]).astype(jnp.float32)

    wqkv = jnp.stack([jnp.concatenate([lp["wq"], lp["wk"], lp["wv"]], axis=1)
                      for lp in layers]).astype(jnp.bfloat16)              # [L, H, 3H]
    bqkv = jnp.stack([jnp.concatenate([lp["bq"], lp["bk"], lp["bv"]])[None, :]
                      for lp in layers]).astype(jnp.float32)               # [L, 1, 3H]

    return {
        "word_emb": params["word_emb"],
        "pos_emb": params["pos_emb"],
        "type_emb": params["type_emb"],
        "emb_ln_g": params["emb_ln_g"].reshape(1, HIDDEN),
        "emb_ln_b": params["emb_ln_b"].reshape(1, HIDDEN),
        "wqkv": wqkv, "bqkv": bqkv,
        "wo": stack_mat("wo"), "bo": stack_vec("bo"),
        "ln1_g": stack_vec("ln1_g"), "ln1_b": stack_vec("ln1_b"),
        "w1": stack_mat("w1"), "b1": stack_vec("b1"),
        "w2": stack_mat("w2"), "b2": stack_vec("b2"),
        "ln2_g": stack_vec("ln2_g"), "ln2_b": stack_vec("ln2_b"),
    }


if __name__ == "__main__":
    key = jax.random.PRNGKey(0)
    pkey, wkey = jax.random.split(key, 2)

    B, S = 2, 8
    params = init_params(pkey)
    packed = pack_params(params)

    word = jax.random.randint(wkey, (B, S), 0, VOCAB, dtype=jnp.int32)
    mask = jnp.concatenate(
        [jnp.ones((B, 6), jnp.int32), jnp.zeros((B, 2), jnp.int32)], axis=1)
    seg = jnp.concatenate(
        [jnp.zeros((B, 4), jnp.int32), jnp.ones((B, 4), jnp.int32)], axis=1)

    inputs = {"word": word, "mask": mask, "seg": seg}

    fwd = jax.jit(bert_encoder_forward)
    out = fwd(packed, inputs["word"], inputs["mask"], inputs["seg"])
    out = jax.block_until_ready(out)

    assert out.shape == (B, S, HIDDEN)
    assert bool(jnp.all(jnp.isfinite(out)))
    print("KERNEL_OK")
</pallas_src>

<mosaic_0001>
module attributes {stable_mosaic.version = 11 : i64} {
  func.func @_encoder_layer_kernel(%arg0: i32, %arg1: i32, %arg2: memref<1x8x32xbf16, #tpu.memory_space<vmem>>, %arg3: memref<1x1x8xf32, #tpu.memory_space<vmem>>, %arg4: memref<1x32xf32, #tpu.memory_space<vmem>>, %arg5: memref<1x32xf32, #tpu.memory_space<vmem>>, %arg6: memref<1x32x96xbf16, #tpu.memory_space<vmem>>, %arg7: memref<1x1x96xf32, #tpu.memory_space<vmem>>, %arg8: memref<1x32x32xbf16, #tpu.memory_space<vmem>>, %arg9: memref<1x1x32xf32, #tpu.memory_space<vmem>>, %arg10: memref<1x1x32xf32, #tpu.memory_space<vmem>>, %arg11: memref<1x1x32xf32, #tpu.memory_space<vmem>>, %arg12: memref<1x32x64xbf16, #tpu.memory_space<vmem>>, %arg13: memref<1x1x64xf32, #tpu.memory_space<vmem>>, %arg14: memref<1x64x32xbf16, #tpu.memory_space<vmem>>, %arg15: memref<1x1x32xf32, #tpu.memory_space<vmem>>, %arg16: memref<1x1x32xf32, #tpu.memory_space<vmem>>, %arg17: memref<1x1x32xf32, #tpu.memory_space<vmem>>, %arg18: memref<1x8x32xf32, #tpu.memory_space<vmem>>, %arg19: memref<8x32xf32, #tpu.memory_space<vmem>>, %arg20: memref<8x32xf32, #tpu.memory_space<vmem>>) attributes {dimension_semantics = [#tpu.dimension_semantics<parallel>, #tpu.dimension_semantics<arbitrary>], iteration_bounds = array<i64: 2, 2>, scalar_prefetch = 0 : i64, scratch_operands = 2 : i64, tpu.core_type = #tpu.core_type<tc>, window_params = [{transform_indices = @transform_0, window_bounds = array<i64: 1, 8, 32>}, {transform_indices = @transform_1, window_bounds = array<i64: 1, 1, 8>}, {pipeline_mode = #tpu.pipeline_mode<synchronous>, transform_indices = @transform_2, window_bounds = array<i64: 1, 32>}, {pipeline_mode = #tpu.pipeline_mode<synchronous>, transform_indices = @transform_3, window_bounds = array<i64: 1, 32>}, {transform_indices = @transform_4, window_bounds = array<i64: 1, 32, 96>}, {transform_indices = @transform_5, window_bounds = array<i64: 1, 1, 96>}, {transform_indices = @transform_6, window_bounds = array<i64: 1, 32, 32>}, {transform_indices = @transform_7, window_bounds = array<i64: 1, 1, 32>}, {transform_indices = @transform_8, window_bounds = array<i64: 1, 1, 32>}, {transform_indices = @transform_9, window_bounds = array<i64: 1, 1, 32>}, {transform_indices = @transform_10, window_bounds = array<i64: 1, 32, 64>}, {transform_indices = @transform_11, window_bounds = array<i64: 1, 1, 64>}, {transform_indices = @transform_12, window_bounds = array<i64: 1, 64, 32>}, {transform_indices = @transform_13, window_bounds = array<i64: 1, 1, 32>}, {transform_indices = @transform_14, window_bounds = array<i64: 1, 1, 32>}, {transform_indices = @transform_15, window_bounds = array<i64: 1, 1, 32>}, {transform_indices = @transform_16, window_bounds = array<i64: 1, 8, 32>}]} {
    %c0_i32 = arith.constant 0 : i32
    %0 = arith.cmpi eq, %arg1, %c0_i32 : i32
    %1 = arith.extui %0 : i1 to i32
    %c0_i32_0 = arith.constant 0 : i32
    %2 = arith.cmpi ne, %1, %c0_i32_0 : i32
    scf.if %2 {
      %c0_76 = arith.constant 0 : index
      %c0_77 = arith.constant 0 : index
      %c0_78 = arith.constant 0 : index
      %154 = vector.load %arg2[%c0_76, %c0_77, %c0_78] : memref<1x8x32xbf16, #tpu.memory_space<vmem>>, vector<1x8x32xbf16>
      %155 = vector.shape_cast %154 : vector<1x8x32xbf16> to vector<8x32xbf16>
      %156 = arith.extf %155 : vector<8x32xbf16> to vector<8x32xf32>
      %c0_79 = arith.constant 0 : index
      %c0_80 = arith.constant 0 : index
      %157 = vector.load %arg4[%c0_79, %c0_80] : memref<1x32xf32, #tpu.memory_space<vmem>>, vector<1x32xf32>
      %c0_81 = arith.constant 0 : index
      %c0_82 = arith.constant 0 : index
      %158 = vector.load %arg5[%c0_81, %c0_82] : memref<1x32xf32, #tpu.memory_space<vmem>>, vector<1x32xf32>
      %cst_83 = arith.constant dense<0.000000e+00> : vector<8xf32>
      %159 = vector.multi_reduction <add>, %156, %cst_83 [1] : vector<8x32xf32> to vector<8xf32>
      %160 = vector.shape_cast %159 : vector<8xf32> to vector<8x1xf32>
      %cst_84 = arith.constant 3.200000e+01 : f32
      %161 = vector.broadcast %cst_84 : f32 to vector<8x1xf32>
      %162 = arith.divf %160, %161 : vector<8x1xf32>
      %163 = vector.broadcast %162 : vector<8x1xf32> to vector<8x32xf32>
      %164 = arith.subf %156, %163 : vector<8x32xf32>
      %165 = arith.mulf %164, %164 : vector<8x32xf32>
      %cst_85 = arith.constant dense<0.000000e+00> : vector<8xf32>
      %166 = vector.multi_reduction <add>, %165, %cst_85 [1] : vector<8x32xf32> to vector<8xf32>
      %167 = vector.shape_cast %166 : vector<8xf32> to vector<8x1xf32>
      %cst_86 = arith.constant 3.200000e+01 : f32
      %168 = vector.broadcast %cst_86 : f32 to vector<8x1xf32>
      %169 = arith.divf %167, %168 : vector<8x1xf32>
      %cst_87 = arith.constant 9.99999996E-13 : f32
      %170 = vector.broadcast %cst_87 : f32 to vector<8x1xf32>
      %171 = arith.addf %169, %170 : vector<8x1xf32>
      %172 = math.rsqrt %171 : vector<8x1xf32>
      %173 = vector.broadcast %172 : vector<8x1xf32> to vector<8x32xf32>
      %174 = arith.mulf %164, %173 : vector<8x32xf32>
      %175 = vector.broadcast %157 : vector<1x32xf32> to vector<8x32xf32>
      %176 = arith.mulf %174, %175 : vector<8x32xf32>
      %177 = vector.broadcast %158 : vector<1x32xf32> to vector<8x32xf32>
      %178 = arith.addf %176, %177 : vector<8x32xf32>
      %c0_88 = arith.constant 0 : index
      %c0_89 = arith.constant 0 : index
      %179 = vector.load %arg19[%c0_88, %c0_89] : memref<8x32xf32, #tpu.memory_space<vmem>>, vector<8x32xf32>
      tpu.vector_store %arg19[%c0_88, %c0_89], %178 {strides = array<i32>} : memref<8x32xf32, #tpu.memory_space<vmem>>, vector<8x32xf32>,
    } else {
    }
    %c0 = arith.constant 0 : index
    %c0_1 = arith.constant 0 : index
    %3 = vector.load %arg19[%c0, %c0_1] : memref<8x32xf32, #tpu.memory_space<vmem>>, vector<8x32xf32>
    %c0_2 = arith.constant 0 : index
    %c0_3 = arith.constant 0 : index
    %c0_4 = arith.constant 0 : index
    %4 = vector.load %arg3[%c0_2, %c0_3, %c0_4] : memref<1x1x8xf32, #tpu.memory_space<vmem>>, vector<1x1x8xf32>
    %5 = vector.shape_cast %4 : vector<1x1x8xf32> to vector<1x8xf32>
    %6 = vector.shape_cast %5 : vector<1x8xf32> to vector<1x8xf32>
    %7 = vector.broadcast %6 : vector<1x8xf32> to vector<8x8xf32>
    %c0_5 = arith.constant 0 : index
    %c0_6 = arith.constant 0 : index
    %c0_7 = arith.constant 0 : index
    %8 = vector.load %arg6[%c0_5, %c0_6, %c0_7] : memref<1x32x96xbf16, #tpu.memory_space<vmem>>, vector<1x32x96xbf16>
    %9 = vector.shape_cast %8 : vector<1x32x96xbf16> to vector<32x96xbf16>
    %10 = arith.truncf %3 : vector<8x32xf32> to vector<8x32xbf16>
    %cst = arith.constant dense<0.000000e+00> : vector<8x96xf32>
    %11 = tpu.matmul %10, %9, %cst {dimension_numbers = #tpu.dot_dimension_numbers<[1], [0], [0], [1], [0, 0, 1, 1], [], []>} : vector<8x32xbf16>, vector<32x96xbf16>, vector<8x96xf32> -> vector<8x96xf32>
    %c0_8 = arith.constant 0 : index
    %c0_9 = arith.constant 0 : index
    %c0_10 = arith.constant 0 : index
    %12 = vector.load %arg7[%c0_8, %c0_9, %c0_10] : memref<1x1x96xf32, #tpu.memory_space<vmem>>, vector<1x1x96xf32>
    %13 = vector.shape_cast %12 : vector<1x1x96xf32> to vector<1x96xf32>
    %14 = vector.broadcast %13 : vector<1x96xf32> to vector<8x96xf32>
    %15 = arith.addf %11, %14 : vector<8x96xf32>
    %16 = vector.extract_strided_slice %15 {offsets = [0, 0], sizes = [8, 16], strides = [1, 1]} : vector<8x96xf32> to vector<8x16xf32>
    %17 = vector.extract_strided_slice %15 {offsets = [0, 32], sizes = [8, 16], strides = [1, 1]} : vector<8x96xf32> to vector<8x16xf32>
    %18 = vector.extract_strided_slice %15 {offsets = [0, 64], sizes = [8, 16], strides = [1, 1]} : vector<8x96xf32> to vector<8x16xf32>
    %19 = arith.truncf %16 : vector<8x16xf32> to vector<8x16xbf16>
    %20 = arith.truncf %17 : vector<8x16xf32> to vector<8x16xbf16>
    "tpu.trace_start"() <{level = 10 : i32, message = "qd,kd->qk"}> : () -> ()
    %cst_11 = arith.constant dense<0.000000e+00> : vector<8x8xf32>
    %21 = tpu.matmul %19, %20, %cst_11 {dimension_numbers = #tpu.dot_dimension_numbers<[1], [1], [0], [0], [0, 0, 1, 0], [], []>} : vector<8x16xbf16>, vector<8x16xbf16>, vector<8x8xf32> -> vector<8x8xf32>
    "tpu.trace_stop"() : () -> ()
    %cst_12 = arith.constant 2.500000e-01 : f32
    %22 = vector.broadcast %cst_12 : f32 to vector<8x8xf32>
    %23 = arith.mulf %21, %22 : vector<8x8xf32>
    %24 = arith.addf %23, %7 : vector<8x8xf32>
    %cst_13 = arith.constant dense<0xFF800000> : vector<8xf32>
    %25 = vector.multi_reduction <maximumf>, %24, %cst_13 [1] : vector<8x8xf32> to vector<8xf32>
    %26 = vector.shape_cast %25 : vector<8xf32> to vector<8x1xf32>
    %27 = vector.broadcast %26 : vector<8x1xf32> to vector<8x8xf32>
    %28 = arith.subf %24, %27 : vector<8x8xf32>
    %29 = math.exp %28 : vector<8x8xf32>
    %cst_14 = arith.constant dense<0.000000e+00> : vector<8xf32>
    %30 = vector.multi_reduction <add>, %29, %cst_14 [1] : vector<8x8xf32> to vector<8xf32>
    %31 = vector.shape_cast %30 : vector<8xf32> to vector<8x1xf32>
    %32 = tpu.reciprocal %31 {approx = true} : vector<8x1xf32> -> vector<8x1xf32>
    %33 = vector.broadcast %32 : vector<8x1xf32> to vector<8x8xf32>
    %34 = arith.mulf %29, %33 : vector<8x8xf32>
    %35 = arith.truncf %34 : vector<8x8xf32> to vector<8x8xbf16>
    %36 = arith.truncf %18 : vector<8x16xf32> to vector<8x16xbf16>
    "tpu.trace_start"() <{level = 10 : i32, message = "qk,kd->qd"}> : () -> ()
    %cst_15 = arith.constant dense<0.000000e+00> : vector<8x16xf32>
    %37 = tpu.matmul %35, %36, %cst_15 {dimension_numbers = #tpu.dot_dimension_numbers<[1], [0], [0], [1], [0, 0, 1, 1], [], []>} : vector<8x8xbf16>, vector<8x16xbf16>, vector<8x16xf32> -> vector<8x16xf32>
    "tpu.trace_stop"() : () -> ()
    %c0_16 = arith.constant 0 : index
    %c0_17 = arith.constant 0 : index
    %38 = vector.load %arg20[%c0_16, %c0_17] : memref<8x32xf32, #tpu.memory_space<vmem>>, vector<8x16xf32>
    tpu.vector_store %arg20[%c0_16, %c0_17], %37 {strides = array<i32>} : memref<8x32xf32, #tpu.memory_space<vmem>>, vector<8x16xf32>,
    %39 = vector.extract_strided_slice %15 {offsets = [0, 16], sizes = [8, 16], strides = [1, 1]} : vector<8x96xf32> to vector<8x16xf32>
    %40 = vector.extract_strided_slice %15 {offsets = [0, 48], sizes = [8, 16], strides = [1, 1]} : vector<8x96xf32> to vector<8x16xf32>
    %41 = vector.extract_strided_slice %15 {offsets = [0, 80], sizes = [8, 16], strides = [1, 1]} : vector<8x96xf32> to vector<8x16xf32>
    %42 = arith.truncf %39 : vector<8x16xf32> to vector<8x16xbf16>
    %43 = arith.truncf %40 : vector<8x16xf32> to vector<8x16xbf16>
    "tpu.trace_start"() <{level = 10 : i32, message = "qd,kd->qk"}> : () -> ()
    %cst_18 = arith.constant dense<0.000000e+00> : vector<8x8xf32>
    %44 = tpu.matmul %42, %43, %cst_18 {dimension_numbers = #tpu.dot_dimension_numbers<[1], [1], [0], [0], [0, 0, 1, 0], [], []>} : vector<8x16xbf16>, vector<8x16xbf16>, vector<8x8xf32> -> vector<8x8xf32>
    "tpu.trace_stop"() : () -> ()
    %cst_19 = arith.constant 2.500000e-01 : f32
    %45 = vector.broadcast %cst_19 : f32 to vector<8x8xf32>
    %46 = arith.mulf %44, %45 : vector<8x8xf32>
    %47 = arith.addf %46, %7 : vector<8x8xf32>
    %cst_20 = arith.constant dense<0xFF800000> : vector<8xf32>
    %48 = vector.multi_reduction <maximumf>, %47, %cst_20 [1] : vector<8x8xf32> to vector<8xf32>
    %49 = vector.shape_cast %48 : vector<8xf32> to vector<8x1xf32>
    %50 = vector.broadcast %49 : vector<8x1xf32> to vector<8x8xf32>
    %51 = arith.subf %47, %50 : vector<8x8xf32>
    %52 = math.exp %51 : vector<8x8xf32>
    %cst_21 = arith.constant dense<0.000000e+00> : vector<8xf32>
    %53 = vector.multi_reduction <add>, %52, %cst_21 [1] : vector<8x8xf32> to vector<8xf32>
    %54 = vector.shape_cast %53 : vector<8xf32> to vector<8x1xf32>
    %55 = tpu.reciprocal %54 {approx = true} : vector<8x1xf32> -> vector<8x1xf32>
    %56 = vector.broadcast %55 : vector<8x1xf32> to vector<8x8xf32>
    %57 = arith.mulf %52, %56 : vector<8x8xf32>
    %58 = arith.truncf %57 : vector<8x8xf32> to vector<8x8xbf16>
    %59 = arith.truncf %41 : vector<8x16xf32> to vector<8x16xbf16>
    "tpu.trace_start"() <{level = 10 : i32, message = "qk,kd->qd"}> : () -> ()
    %cst_22 = arith.constant dense<0.000000e+00> : vector<8x16xf32>
    %60 = tpu.matmul %58, %59, %cst_22 {dimension_numbers = #tpu.dot_dimension_numbers<[1], [0], [0], [1], [0, 0, 1, 1], [], []>} : vector<8x8xbf16>, vector<8x16xbf16>, vector<8x16xf32> -> vector<8x16xf32>
    "tpu.trace_stop"() : () -> ()
    %c0_23 = arith.constant 0 : index
    %c16 = arith.constant 16 : index
    %61 = vector.load %arg20[%c0_23, %c16] : memref<8x32xf32, #tpu.memory_space<vmem>>, vector<8x16xf32>
    tpu.vector_store %arg20[%c0_23, %c16], %60 {strides = array<i32>} : memref<8x32xf32, #tpu.memory_space<vmem>>, vector<8x16xf32>,
    %c0_24 = arith.constant 0 : index
    %c0_25 = arith.constant 0 : index
    %62 = vector.load %arg20[%c0_24, %c0_25] : memref<8x32xf32, #tpu.memory_space<vmem>>, vector<8x32xf32>
    %c0_26 = arith.constant 0 : index
    %c0_27 = arith.constant 0 : index
    %c0_28 = arith.constant 0 : index
    %63 = vector.load %arg8[%c0_26, %c0_27, %c0_28] : memref<1x32x32xbf16, #tpu.memory_space<vmem>>, vector<1x32x32xbf16>
    %64 = vector.shape_cast %63 : vector<1x32x32xbf16> to vector<32x32xbf16>
    %65 = arith.truncf %62 : vector<8x32xf32> to vector<8x32xbf16>
    %cst_29 = arith.constant dense<0.000000e+00> : vector<8x32xf32>
    %66 = tpu.matmul %65, %64, %cst_29 {dimension_numbers = #tpu.dot_dimension_numbers<[1], [0], [0], [1], [0, 0, 1, 1], [], []>} : vector<8x32xbf16>, vector<32x32xbf16>, vector<8x32xf32> -> vector<8x32xf32>
    %c0_30 = arith.constant 0 : index
    %c0_31 = arith.constant 0 : index
    %c0_32 = arith.constant 0 : index
    %67 = vector.load %arg9[%c0_30, %c0_31, %c0_32] : memref<1x1x32xf32, #tpu.memory_space<vmem>>, vector<1x1x32xf32>
    %68 = vector.shape_cast %67 : vector<1x1x32xf32> to vector<1x32xf32>
    %69 = vector.broadcast %68 : vector<1x32xf32> to vector<8x32xf32>
    %70 = arith.addf %66, %69 : vector<8x32xf32>
    %71 = arith.addf %70, %3 : vector<8x32xf32>
    %c0_33 = arith.constant 0 : index
    %c0_34 = arith.constant 0 : index
    %c0_35 = arith.constant 0 : index
    %72 = vector.load %arg10[%c0_33, %c0_34, %c0_35] : memref<1x1x32xf32, #tpu.memory_space<vmem>>, vector<1x1x32xf32>
    %73 = vector.shape_cast %72 : vector<1x1x32xf32> to vector<1x32xf32>
    %c0_36 = arith.constant 0 : index
    %c0_37 = arith.constant 0 : index
    %c0_38 = arith.constant 0 : index
    %74 = vector.load %arg11[%c0_36, %c0_37, %c0_38] : memref<1x1x32xf32, #tpu.memory_space<vmem>>, vector<1x1x32xf32>
    %75 = vector.shape_cast %74 : vector<1x1x32xf32> to vector<1x32xf32>
    %cst_39 = arith.constant dense<0.000000e+00> : vector<8xf32>
    %76 = vector.multi_reduction <add>, %71, %cst_39 [1] : vector<8x32xf32> to vector<8xf32>
    %77 = vector.shape_cast %76 : vector<8xf32> to vector<8x1xf32>
    %cst_40 = arith.constant 3.200000e+01 : f32
    %78 = vector.broadcast %cst_40 : f32 to vector<8x1xf32>
    %79 = arith.divf %77, %78 : vector<8x1xf32>
    %80 = vector.broadcast %79 : vector<8x1xf32> to vector<8x32xf32>
    %81 = arith.subf %71, %80 : vector<8x32xf32>
    %82 = arith.mulf %81, %81 : vector<8x32xf32>
    %cst_41 = arith.constant dense<0.000000e+00> : vector<8xf32>
    %83 = vector.multi_reduction <add>, %82, %cst_41 [1] : vector<8x32xf32> to vector<8xf32>
    %84 = vector.shape_cast %83 : vector<8xf32> to vector<8x1xf32>
    %cst_42 = arith.constant 3.200000e+01 : f32
    %85 = vector.broadcast %cst_42 : f32 to vector<8x1xf32>
    %86 = arith.divf %84, %85 : vector<8x1xf32>
    %cst_43 = arith.constant 9.99999996E-13 : f32
    %87 = vector.broadcast %cst_43 : f32 to vector<8x1xf32>
    %88 = arith.addf %86, %87 : vector<8x1xf32>
    %89 = math.rsqrt %88 : vector<8x1xf32>
    %90 = vector.broadcast %89 : vector<8x1xf32> to vector<8x32xf32>
    %91 = arith.mulf %81, %90 : vector<8x32xf32>
    %92 = vector.broadcast %73 : vector<1x32xf32> to vector<8x32xf32>
    %93 = arith.mulf %91, %92 : vector<8x32xf32>
    %94 = vector.broadcast %75 : vector<1x32xf32> to vector<8x32xf32>
    %95 = arith.addf %93, %94 : vector<8x32xf32>
    %c0_44 = arith.constant 0 : index
    %c0_45 = arith.constant 0 : index
    %c0_46 = arith.constant 0 : index
    %96 = vector.load %arg12[%c0_44, %c0_45, %c0_46] : memref<1x32x64xbf16, #tpu.memory_space<vmem>>, vector<1x32x64xbf16>
    %97 = vector.shape_cast %96 : vector<1x32x64xbf16> to vector<32x64xbf16>
    %98 = arith.truncf %95 : vector<8x32xf32> to vector<8x32xbf16>
    %cst_47 = arith.constant dense<0.000000e+00> : vector<8x64xf32>
    %99 = tpu.matmul %98, %97, %cst_47 {dimension_numbers = #tpu.dot_dimension_numbers<[1], [0], [0], [1], [0, 0, 1, 1], [], []>} : vector<8x32xbf16>, vector<32x64xbf16>, vector<8x64xf32> -> vector<8x64xf32>
    %c0_48 = arith.constant 0 : index
    %c0_49 = arith.constant 0 : index
    %c0_50 = arith.constant 0 : index
    %100 = vector.load %arg13[%c0_48, %c0_49, %c0_50] : memref<1x1x64xf32, #tpu.memory_space<vmem>>, vector<1x1x64xf32>
    %101 = vector.shape_cast %100 : vector<1x1x64xf32> to vector<1x64xf32>
    %102 = vector.broadcast %101 : vector<1x64xf32> to vector<8x64xf32>
    %103 = arith.addf %99, %102 : vector<8x64xf32>
    %cst_51 = arith.constant 5.000000e-01 : f32
    %104 = vector.broadcast %cst_51 : f32 to vector<8x64xf32>
    %105 = arith.mulf %104, %103 : vector<8x64xf32>
    %cst_52 = arith.constant 4.471500e-02 : f32
    %106 = vector.broadcast %cst_52 : f32 to vector<8x64xf32>
    %107 = arith.mulf %106, %103 : vector<8x64xf32>
    %108 = arith.mulf %107, %103 : vector<8x64xf32>
    %109 = arith.mulf %108, %103 : vector<8x64xf32>
    %110 = arith.addf %103, %109 : vector<8x64xf32>
    %cst_53 = arith.constant 0.797884583 : f32
    %111 = vector.broadcast %cst_53 : f32 to vector<8x64xf32>
    %112 = arith.mulf %111, %110 : vector<8x64xf32>
    %113 = math.tanh %112 : vector<8x64xf32>
    %cst_54 = arith.constant 1.000000e+00 : f32
    %114 = vector.broadcast %cst_54 : f32 to vector<8x64xf32>
    %115 = arith.addf %114, %113 : vector<8x64xf32>
    %116 = arith.mulf %105, %115 : vector<8x64xf32>
    %c0_55 = arith.constant 0 : index
    %c0_56 = arith.constant 0 : index
    %c0_57 = arith.constant 0 : index
    %117 = vector.load %arg14[%c0_55, %c0_56, %c0_57] : memref<1x64x32xbf16, #tpu.memory_space<vmem>>, vector<1x64x32xbf16>
    %118 = vector.shape_cast %117 : vector<1x64x32xbf16> to vector<64x32xbf16>
    %119 = arith.truncf %116 : vector<8x64xf32> to vector<8x64xbf16>
    %cst_58 = arith.constant dense<0.000000e+00> : vector<8x32xf32>
    %120 = tpu.matmul %119, %118, %cst_58 {dimension_numbers = #tpu.dot_dimension_numbers<[1], [0], [0], [1], [0, 0, 1, 1], [], []>} : vector<8x64xbf16>, vector<64x32xbf16>, vector<8x32xf32> -> vector<8x32xf32>
    %c0_59 = arith.constant 0 : index
    %c0_60 = arith.constant 0 : index
    %c0_61 = arith.constant 0 : index
    %121 = vector.load %arg15[%c0_59, %c0_60, %c0_61] : memref<1x1x32xf32, #tpu.memory_space<vmem>>, vector<1x1x32xf32>
    %122 = vector.shape_cast %121 : vector<1x1x32xf32> to vector<1x32xf32>
    %123 = vector.broadcast %122 : vector<1x32xf32> to vector<8x32xf32>
    %124 = arith.addf %120, %123 : vector<8x32xf32>
    %125 = arith.addf %124, %95 : vector<8x32xf32>
    %c0_62 = arith.constant 0 : index
    %c0_63 = arith.constant 0 : index
    %c0_64 = arith.constant 0 : index
    %126 = vector.load %arg16[%c0_62, %c0_63, %c0_64] : memref<1x1x32xf32, #tpu.memory_space<vmem>>, vector<1x1x32xf32>
    %127 = vector.shape_cast %126 : vector<1x1x32xf32> to vector<1x32xf32>
    %c0_65 = arith.constant 0 : index
    %c0_66 = arith.constant 0 : index
    %c0_67 = arith.constant 0 : index
    %128 = vector.load %arg17[%c0_65, %c0_66, %c0_67] : memref<1x1x32xf32, #tpu.memory_space<vmem>>, vector<1x1x32xf32>
    %129 = vector.shape_cast %128 : vector<1x1x32xf32> to vector<1x32xf32>
    %cst_68 = arith.constant dense<0.000000e+00> : vector<8xf32>
    %130 = vector.multi_reduction <add>, %125, %cst_68 [1] : vector<8x32xf32> to vector<8xf32>
    %131 = vector.shape_cast %130 : vector<8xf32> to vector<8x1xf32>
    %cst_69 = arith.constant 3.200000e+01 : f32
    %132 = vector.broadcast %cst_69 : f32 to vector<8x1xf32>
    %133 = arith.divf %131, %132 : vector<8x1xf32>
    %134 = vector.broadcast %133 : vector<8x1xf32> to vector<8x32xf32>
    %135 = arith.subf %125, %134 : vector<8x32xf32>
    %136 = arith.mulf %135, %135 : vector<8x32xf32>
    %cst_70 = arith.constant dense<0.000000e+00> : vector<8xf32>
    %137 = vector.multi_reduction <add>, %136, %cst_70 [1] : vector<8x32xf32> to vector<8xf32>
    %138 = vector.shape_cast %137 : vector<8xf32> to vector<8x1xf32>
    %cst_71 = arith.constant 3.200000e+01 : f32
    %139 = vector.broadcast %cst_71 : f32 to vector<8x1xf32>
    %140 = arith.divf %138, %139 : vector<8x1xf32>
    %cst_72 = arith.constant 9.99999996E-13 : f32
    %141 = vector.broadcast %cst_72 : f32 to vector<8x1xf32>
    %142 = arith.addf %140, %141 : vector<8x1xf32>
    %143 = math.rsqrt %142 : vector<8x1xf32>
    %144 = vector.broadcast %143 : vector<8x1xf32> to vector<8x32xf32>
    %145 = arith.mulf %135, %144 : vector<8x32xf32>
    %146 = vector.broadcast %127 : vector<1x32xf32> to vector<8x32xf32>
    %147 = arith.mulf %145, %146 : vector<8x32xf32>
    %148 = vector.broadcast %129 : vector<1x32xf32> to vector<8x32xf32>
    %149 = arith.addf %147, %148 : vector<8x32xf32>
    %c0_73 = arith.constant 0 : index
    %c0_74 = arith.constant 0 : index
    %150 = vector.load %arg19[%c0_73, %c0_74] : memref<8x32xf32, #tpu.memory_space<vmem>>, vector<8x32xf32>
    tpu.vector_store %arg19[%c0_73, %c0_74], %149 {strides = array<i32>} : memref<8x32xf32, #tpu.memory_space<vmem>>, vector<8x32xf32>,
    %c1_i32 = arith.constant 1 : i32
    %151 = arith.cmpi eq, %arg1, %c1_i32 : i32
    %152 = arith.extui %151 : i1 to i32
    %c0_i32_75 = arith.constant 0 : i32
    %153 = arith.cmpi ne, %152, %c0_i32_75 : i32
    scf.if %153 {
      %c0_76 = arith.constant 0 : index
      %c0_77 = arith.constant 0 : index
      %c0_78 = arith.constant 0 : index
      %154 = vector.load %arg18[%c0_76, %c0_77, %c0_78] : memref<1x8x32xf32, #tpu.memory_space<vmem>>, vector<1x8x32xf32>
      %155 = vector.shape_cast %154 : vector<1x8x32xf32> to vector<8x32xf32>
      %156 = vector.shape_cast %149 : vector<8x32xf32> to vector<1x8x32xf32>
      tpu.vector_store %arg18[%c0_76, %c0_77, %c0_78], %156 {strides = array<i32>} : memref<1x8x32xf32, #tpu.memory_space<vmem>>, vector<1x8x32xf32>,
    } else {
    }
    return
  }
  func.func @transform_0(%arg0: i32, %arg1: i32) -> (i32, i32, i32) {
    %c0_i32 = arith.constant 0 : i32
    %c0_i32_0 = arith.constant 0 : i32
    %c0_i32_1 = arith.constant 0 : i32
    return %arg0, %c0_i32, %c0_i32_0 : i32, i32, i32
  }
  func.func @transform_1(%arg0: i32, %arg1: i32) -> (i32, i32, i32) {
    %c0_i32 = arith.constant 0 : i32
    %c0_i32_0 = arith.constant 0 : i32
    %c0_i32_1 = arith.constant 0 : i32
    return %arg0, %c0_i32, %c0_i32_0 : i32, i32, i32
  }
  func.func @transform_2(%arg0: i32, %arg1: i32) -> (i32, i32) {
    %c0_i32 = arith.constant 0 : i32
    %c0_i32_0 = arith.constant 0 : i32
    %c0_i32_1 = arith.constant 0 : i32
    return %c0_i32, %c0_i32_0 : i32, i32
  }
  func.func @transform_3(%arg0: i32, %arg1: i32) -> (i32, i32) {
    %c0_i32 = arith.constant 0 : i32
    %c0_i32_0 = arith.constant 0 : i32
    %c0_i32_1 = arith.constant 0 : i32
    return %c0_i32, %c0_i32_0 : i32, i32
  }
  func.func @transform_4(%arg0: i32, %arg1: i32) -> (i32, i32, i32) {
    %c0_i32 = arith.constant 0 : i32
    %c0_i32_0 = arith.constant 0 : i32
    %c0_i32_1 = arith.constant 0 : i32
    return %arg1, %c0_i32, %c0_i32_0 : i32, i32, i32
  }
  func.func @transform_5(%arg0: i32, %arg1: i32) -> (i32, i32, i32) {
    %c0_i32 = arith.constant 0 : i32
    %c0_i32_0 = arith.constant 0 : i32
    %c0_i32_1 = arith.constant 0 : i32
    return %arg1, %c0_i32, %c0_i32_0 : i32, i32, i32
  }
  func.func @transform_6(%arg0: i32, %arg1: i32) -> (i32, i32, i32) {
    %c0_i32 = arith.constant 0 : i32
    %c0_i32_0 = arith.constant 0 : i32
    %c0_i32_1 = arith.constant 0 : i32
    return %arg1, %c0_i32, %c0_i32_0 : i32, i32, i32
  }
  func.func @transform_7(%arg0: i32, %arg1: i32) -> (i32, i32, i32) {
    %c0_i32 = arith.constant 0 : i32
    %c0_i32_0 = arith.constant 0 : i32
    %c0_i32_1 = arith.constant 0 : i32
    return %arg1, %c0_i32, %c0_i32_0 : i32, i32, i32
  }
  func.func @transform_8(%arg0: i32, %arg1: i32) -> (i32, i32, i32) {
    %c0_i32 = arith.constant 0 : i32
    %c0_i32_0 = arith.constant 0 : i32
    %c0_i32_1 = arith.constant 0 : i32
    return %arg1, %c0_i32, %c0_i32_0 : i32, i32, i32
  }
  func.func @transform_9(%arg0: i32, %arg1: i32) -> (i32, i32, i32) {
    %c0_i32 = arith.constant 0 : i32
    %c0_i32_0 = arith.constant 0 : i32
    %c0_i32_1 = arith.constant 0 : i32
    return %arg1, %c0_i32, %c0_i32_0 : i32, i32, i32
  }
  func.func @transform_10(%arg0: i32, %arg1: i32) -> (i32, i32, i32) {
    %c0_i32 = arith.constant 0 : i32
    %c0_i32_0 = arith.constant 0 : i32
    %c0_i32_1 = arith.constant 0 : i32
    return %arg1, %c0_i32, %c0_i32_0 : i32, i32, i32
  }
  func.func @transform_11(%arg0: i32, %arg1: i32) -> (i32, i32, i32) {
    %c0_i32 = arith.constant 0 : i32
    %c0_i32_0 = arith.constant 0 : i32
    %c0_i32_1 = arith.constant 0 : i32
    return %arg1, %c0_i32, %c0_i32_0 : i32, i32, i32
  }
  func.func @transform_12(%arg0: i32, %arg1: i32) -> (i32, i32, i32) {
    %c0_i32 = arith.constant 0 : i32
    %c0_i32_0 = arith.constant 0 : i32
    %c0_i32_1 = arith.constant 0 : i32
    return %arg1, %c0_i32, %c0_i32_0 : i32, i32, i32
  }
  func.func @transform_13(%arg0: i32, %arg1: i32) -> (i32, i32, i32) {
    %c0_i32 = arith.constant 0 : i32
    %c0_i32_0 = arith.constant 0 : i32
    %c0_i32_1 = arith.constant 0 : i32
    return %arg1, %c0_i32, %c0_i32_0 : i32, i32, i32
  }
  func.func @transform_14(%arg0: i32, %arg1: i32) -> (i32, i32, i32) {
    %c0_i32 = arith.constant 0 : i32
    %c0_i32_0 = arith.constant 0 : i32
    %c0_i32_1 = arith.constant 0 : i32
    return %arg1, %c0_i32, %c0_i32_0 : i32, i32, i32
  }
  func.func @transform_15(%arg0: i32, %arg1: i32) -> (i32, i32, i32) {
    %c0_i32 = arith.constant 0 : i32
    %c0_i32_0 = arith.constant 0 : i32
    %c0_i32_1 = arith.constant 0 : i32
    return %arg1, %c0_i32, %c0_i32_0 : i32, i32, i32
  }
  func.func @transform_16(%arg0: i32, %arg1: i32) -> (i32, i32, i32) {
    %c0_i32 = arith.constant 0 : i32
    %c0_i32_0 = arith.constant 0 : i32
    %c0_i32_1 = arith.constant 0 : i32
    return %arg0, %c0_i32, %c0_i32_0 : i32, i32, i32
  }
}

</mosaic_0001>

<bundles_post_ra>
// kernel: bert_encoder_forward.1
= control target key start
LH: loop header
LB: loop body
LE: loop exit
PB: predicated region body
PF: predicated region fallthrough
CT: control target
= control target key end

     0   :  { %s2056_s0 = inlined_call_operand.vmem [shape: bf16[2,8,32], index: 0, kind: input, shape index: {}]   ;;  %s2057_s1 = inlined_call_operand.vmem [shape: f32[2,1,8], index: 1, kind: input, shape index: {}]   ;;  %s2058_s2 = inlined_call_operand.vmem [shape: f32[1,32], index: 2, kind: input, shape index: {}]   ;;  %s2059_s3 = inlined_call_operand.vmem [shape: f32[1,32], index: 3, kind: input, shape index: {}]   ;;  %s2060_s4 = inlined_call_operand.vmem [shape: bf16[2,32,96], index: 4, kind: input, shape index: {}]   ;;  %s2061_s5 = inlined_call_operand.vmem [shape: f32[2,1,96], index: 5, kind: input, shape index: {}]   ;;  %s2062_s6 = inlined_call_operand.vmem [shape: bf16[2,32,32], index: 6, kind: input, shape index: {}]   ;;  %s2063_s7 = inlined_call_operand.vmem [shape: f32[2,1,32], index: 7, kind: input, shape index: {}]   ;;  %s2064_s8 = inlined_call_operand.vmem [shape: f32[2,1,32], index: 8, kind: input, shape index: {}]   ;;  %s2065_s9 = inlined_call_operand.vmem [shape: f32[2,1,32], index: 9, kind: input, shape index: {}]   ;;  %s2066_s10 = inlined_call_operand.vmem [shape: bf16[2,32,64], index: 10, kind: input, shape index: {}]   ;;  %s2067_s11 = inlined_call_operand.vmem [shape: f32[2,1,64], index: 11, kind: input, shape index: {}]   ;;  %s2068_s12 = inlined_call_operand.vmem [shape: bf16[2,64,32], index: 12, kind: input, shape index: {}]   ;;  %s2069_s13 = inlined_call_operand.vmem [shape: f32[2,1,32], index: 13, kind: input, shape index: {}]   ;;  %s2070_s14 = inlined_call_operand.vmem [shape: f32[2,1,32], index: 14, kind: input, shape index: {}]   ;;  %s2071_s15 = inlined_call_operand.vmem [shape: f32[2,1,32], index: 15, kind: input, shape index: {}]   ;;  %s2072_s16 = inlined_call_operand.hbm [shape: f32[2,8,32], index: 16, kind: output, shape index: {}]  }
   0x1   :  { %2088 = sst [smem:[#allocation20_spill]] %s2056_s0 }
   0x2   :  { %2089 = sst [smem:[#allocation21_spill]] %s2057_s1 }
   0x3   :  { %2090 = sst [smem:[#allocation22_spill]] %s2058_s2 }
   0x4   :  { %2091 = sst [smem:[#allocation23_spill]] %s2059_s3 }
   0x5   :  { %2092 = sst [smem:[#allocation24_spill]] %s2060_s4 }
   0x6   :  { %2093 = sst [smem:[#allocation25_spill]] %s2062_s6 }
   0x7   :  { %2094 = sst [smem:[#allocation26_spill]] %s2065_s9 }
   0x8   :  { %2095 = sst [smem:[#allocation27_spill]] %s2066_s10 }
   0x9   :  { %2096 = sst [smem:[#allocation28_spill]] %s2070_s14 }
   0xa   :  { %2097 = sst [smem:[#allocation29_spill]] %s2071_s15 }
   0xb   :  { %2098 = sst [smem:[#allocation30_spill]] %s2072_s16 }
   0xc   :  { %21 = vsyncpa [#allocation5], 0 }
   0xd   :  { %23 = vsyncpa [#allocation5 + $0x1], 0  ;;  %s1766_s21 = smov 0   ;;  %s1768_s22 = smov 0  }
   0xe   :  { %s1770_s23 = smov 0   ;;  %s1772_s24 = smov 0  }
   0xf   :  { %s1774_s25 = smov 0   ;;  %s1776_s26 = smov 0  }
  0x10   :  { %s1778_s27 = smov 0   ;;  %s1780_s28 = smov 0  }
  0x11 LB: > { %2099 = sst [smem:[#allocation7_spill]] %s1643_s21  ;;  %s1384_s29 = sadd.s32 4294967295, %s1671_s28   ;;  %s1671_s28 = sphi %s1780_s28, %s29_s28   ;;  %s1667_s27 = sphi %s1778_s27, %s2149_s27   ;;  %s1663_s26 = sphi %s1776_s26, %s2148_s26   ;;  %s1659_s25 = sphi %s1774_s25, %s2147_s25   ;;  %s1655_s24 = sphi %s1772_s24, %s2146_s24   ;;  %s1651_s23 = sphi %s1770_s23, %s2145_s23   ;;  %s1647_s22 = sphi %s1768_s22, %s2144_s22   ;;  %s1643_s21 = sphi %s1766_s21, %s2143_s21  }
  0x12   : > { %2100 = sst [smem:[#allocation8_spill]] %s1647_s22  ;;  %s1385_s30 = sadd.s32 4294967294, %s1671_s28  }
  0x13   : > { %2101 = sst [smem:[#allocation9_spill]] %s1651_s23  ;;  %s38_s0 = sadd.s32 1, %s1663_s26 }
  0x14   : > { %2102 = sst [smem:[#allocation10_spill]] %s1655_s24  ;;  %p39_p0 = scmp.ge.s32.totalorder %s38_s0, 2 }
  0x15   : > { %2103 = sst [smem:[#allocation11_spill]] %s1659_s25  ;;  %s41_s17 = sadd.s32 1, %s1667_s27 }
  0x16   : > { %2104 = sst [smem:[#allocation12_spill]] %s1663_s26  ;;  %p464_p1 = scmp.ne.s32.totalorder %s1651_s23, %s1647_s22 }
  0x17   : > { %2105 = sst [smem:[#allocation13_spill]] %s1667_s27  ;;  %p465_p2 = scmp.eq.s32.totalorder %s1384_s29, 3 }
  0x18   : > { %2106 = sst [smem:[#allocation14_spill]] %s1671_s28  ;;  %s2151_s0 = smov (%p39_p0, %s38_s0), 0 }
  0x19   : > { %2107 = sst [smem:[#allocation15_spill]] %s2151_s0  ;;  %s2153_s17 = smov (!%p39_p0, %s41_s17), %s1667_s27 }
  0x1a   : > { %p1815_p3 = por %p465_p2, %p464_p1  ;;  %p470_p4 = scmp.ne.s32.totalorder %s1647_s22, %s1643_s21 }
  0x1b   : > { %p43_p5 = scmp.ge.s32.totalorder %s2153_s17, 2  ;;  %p471_p6 = scmp.eq.s32.totalorder %s1385_s30, 3 }
  0x1c   : > { %s2108_s18 = scalar_select %p1815_p3, 1, 0 }
  0x1d   : > { %p1388_p7 = scmp.ge.s32.totalorder %s1671_s28, 1  ;;  %p588_p8 = scmp.lt.s32.totalorder %s1671_s28, 5 }
  0x1e   : > { %2109 = sst [smem:[#allocation16_spill]] %s2108_s18  ;;  %s2155_s17 = smov (%p43_p5, %s2153_s17), 0 }
  0x1f   : > { %2110 = sst [smem:[#allocation17_spill]] %s2155_s17  ;;  %p1825_p9 = por %p471_p6, %p470_p4 }
  0x20   : > { %p589_p10 = pnand %p1388_p7, %p588_p8  ;;  %s451_s20 = ssub.s32 %s1667_s27, %s2155_s17 }
  0x21   : > { %s2111_s19 = scalar_select %p1825_p9, 1, 0 }
  0x22   : > { %s454_s29 = sadd.s32 1, %s1651_s23  ;;  %p452_p11 = scmp.eq.s32.totalorder %s451_s20, 0 }
  0x23   : > { %2112 = sst [smem:[#allocation18_spill]] %s2111_s19  ;;  %592 = sbr.rel (%p589_p10) target bundleno = 2207 (0x89f), region = 84 }
  0x24   : > { %s1833_s0 = scalar_select %p452_p11, %s1651_s23, %s454_s29  }
  0x25   : > { %s2076_s30 = sand.u32 (!%p589_p10), 1, %s1647_s22   ;;  %p684_p12 = scmp.lt.s32.totalorder (!%p589_p10), %s1659_s25, 1 }
  0x26   : > { %2113 = sst [smem:[#allocation19_spill]] %s1833_s0  ;;  %s1839_s26 = sshll.u32 (!%p589_p10), %s2076_s30, 3 }
  0x27   : > { %p691_p13 = scmp.lt.s32.totalorder (!%p589_p10), %s1655_s24, 1  ;;  %s2115_s21 = sld [smem:[#allocation20_spill]] (!%p589_p10) }
  0x28   : > { %s1843_s19 = scalar_select %p684_p12, %s1659_s25, 1 }
  0x29   : > { %s1846_s20 = scalar_select %p691_p13, %s1655_s24, 1 }
  0x2a   : > { %s1390_s29 = sshll.u32 %s1843_s19, 2  ;;  %s2116_s4 = sld [smem:[#allocation24_spill]] }
  0x2b   : > { %s1453_s16 = sshll.u32 %s1846_s20, 4  ;;  %s2117_s6 = sld [smem:[#allocation25_spill]] }
  0x2c   : > { %s2119_s10 = sld [smem:[#allocation27_spill]]  ;;  %s720_s24 = scalar_lea.vmem %s2067_s11, %s1846_s20 }
  0x2d   : > { %s687_s28 = scalar_lea.vmem %s2115_s21, %s1390_s29  ;;  %s728_s23 = scalar_lea.vmem %s2069_s13, %s1846_s20 }
  0x2e   : > { %s683_s14 = scalar_lea.vmem [#allocation4], %s1839_s26  ;;  %s2122_s15 = sld [smem:[#allocation10_spill]] }
  0x30   : > { %s1860_s25 = scalar_lea.vmem %s2116_s4, %s1453_s16  ;;  %s2120_s4 = sld [smem:[#allocation28_spill]] }
  0x31   : > { %s1869_s17 = scalar_lea.vmem %s2117_s6, %s1453_s16  ;;  %s1456_s6 = sshll.u32 %s1846_s20, 5 }
  0x32   : > { %s1886_s3 = scalar_lea.vmem %s2119_s10, %s1453_s16  ;;  %s1900_s29 = scalar_lea.vmem %s2068_s12, %s1456_s6 }
  0x33   : > { %s2121_s10 = sld [smem:[#allocation29_spill]] }
  0x34   : > { %p1399_p0 = scmp.ne.s32.totalorder %s2122_s15, 0 }
  0x35   : > { %s2124_s30 = sld [smem:[#allocation23_spill]] (!%p1399_p0) }
  0x36   : > { %s731_s1 = scalar_lea.vmem %s2120_s4, %s1846_s20  ;;  %739 = sbr.rel (%p1399_p0) target bundleno = 331 (0x14b), region = 88 }
  0x39   : > { %s734_s9 = scalar_lea.vmem %s2121_s10, %s1846_s20  ;;  %s2123_s10 = sld [smem:[#allocation22_spill]] (!%p1399_p0) }
  0x3b   : > { %v740_v0 = vld [vmem:[%s687_s28] sm:$0xf]  ;;  %vm744_vm0 = vcmask 261120   ;;  %v1673_v3 = vmov 32.0  }
  0x3c   : > { %v741_v1 = vunpack.c.l.bf16 %v740_v0  ;;  %1548 = vrcp.f32 %v1673_v3  ;;  %v1547_v26 = vld [vmem:[%s2124_s30] ss:$0 sm:$0xff] }
  0x3e   : > { %v745_v2 = vsel %vm744_vm0, %v741_v1, 0.0 }
  0x3f   : > { %746 = vadd.xlane.f32.xlu0 %v745_v2  ;;  %v1546_v24 = vld [vmem:[%s2123_s10] ss:$0 sm:$0xff] }
  0x42   : > { %v1549_v4 = vpop.eup %1548 }
  0x43   : > { %v749_v5 = vmul.f32 32.0, %v1549_v4  ;;  %vm753_vm1 = vweird.f32 %v1549_v4 }
  0x45   : > { %v750_v6 = vsub.f32 1.0, %v749_v5 }
  0x47   : > { %v751_v7 = vmul.f32 %v1549_v4, %v750_v6 }
  0x49   : > { %v752_v8 = vadd.f32 %v1549_v4, %v751_v7 }
  0x4b   : > { %v754_v9 = vsel %vm753_vm1, %v1549_v4, %v752_v8 }
  0xb2   : > { %v747_v10 = vpop.xlane.xlu0 %746 }
  0xb3   : > { %v755_v11 = vmul.f32 %v754_v9, %v747_v10 }
  0xb5   : > { %v756_v12 = vsub.f32 %v741_v1, %v755_v11 }
  0xb7   : > { %v757_v13 = vmul.f32 %v756_v12, %v756_v12 }
  0xb9   : > { %v758_v14 = vsel %vm744_vm0, %v757_v13, 0.0 }
  0xba   : > { %759 = vadd.xlane.f32.xlu0 %v758_v14 }
 0x12d   : > { %v760_v15 = vpop.xlane.xlu0 %759 }
 0x12e   : > { %v761_v16 = vmul.f32 %v760_v15, %v754_v9 }
 0x130   : > { %v762_v17 = vadd.f32 1e-12, %v761_v16 }
 0x132   : > { %1550 = vrsqrt.f32 %v762_v17  ;;  %vm769_vm3 = vweird.f32 %v762_v17 }
 0x138   : > { %v1551_v18 = vpop.eup %1550 }
 0x139   : > { %v764_v19 = vmul.f32 %v1551_v18, %v762_v17  ;;  %vm770_vm2 = vweird.f32 %v1551_v18 }
 0x13a   : > { %vm771_vm4 = vmor %vm769_vm3, %vm770_vm2 }
 0x13b   : > { %v765_v20 = vmul.f32 %v1551_v18, %v764_v19 }
 0x13d   : > { %v766_v21 = vmul.f32 0.5, %v765_v20 }
 0x13f   : > { %v767_v22 = vsub.f32 1.5, %v766_v21 }
 0x141   : > { %v768_v23 = vmul.f32 %v1551_v18, %v767_v22 }
 0x143   : > { %v772_v25 = vsel %vm771_vm4, %v1551_v18, %v768_v23 }
 0x144   : > { %v773_v27 = vmul.f32 %v772_v25, %v756_v12 }
 0x146   : > { %v777_v28 = vmul.f32 %v1546_v24, %v773_v27 }
 0x148   : > { %v781_v29 = vadd.f32 %v1547_v26, %v777_v28 }
 0x14a   : > { %782 = vst.msk [vmem:[#allocation2] sm:$0xff] %vm744_vm0, %v781_v29 }
 0x14b PF: > { %v1458_v30 = vld [vmem:[%s1860_s25 + $0x8] sm:$0xff]  ;;  %v1457_v31 = vld [vmem:[%s1860_s25] sm:$0xff]  ;;  %vm809_vm5 = vcmask 261120   ;;  %s2125_s22 = scalar_lea.vmem %s2061_s5, %s1846_s20  ;;  %s1674_s18 = smov 112   ;;  %vm830_vm6 = vcmask 130048   ;;  %vm870_vm7 = vcmask 1043456  }
 0x14c   : > { %819 = vmatpush.bf16.msra.mxu0 %v1458_v30  ;;  %v1552_v34 = vld [vmem:[%s2125_s22] ss:$0 sm:$0xff]  ;;  %s1675_s25 = smov 96   ;;  %s1676_s16 = smov 80   ;;  %vm852_vm8 = vcmask 64512   ;;  %v1460_v13 = vld [vmem:[%s1869_s17 + $0x8] sm:$0xff] }
 0x14d   : > { %s1677_s2 = smov 64   ;;  %s1678_s15 = smov 48   ;;  %v1459_v18 = vld [vmem:[%s1869_s17] sm:$0xff]  ;;  %vm950_vm9 = vcmask 261248   ;;  %v1680_v28 = vmov 32.0   ;;  %vm1113_vm14 = vcmask 523264  }
 0x14e   : > { %s2126_s10 = sld [smem:[#allocation21_spill]]  ;;  %s2128_s21 = scalar_lea.vmem %s2063_s7, %s1846_s20 }
 0x14f   : > { %v1554_v22 = vld [vmem:[%s2128_s21] ss:$0 sm:$0xff]  ;;  %s2129_s0 = scalar_lea.vmem %s2064_s8, %s1846_s20  ;;  %s2134_s27 = sld [smem:[#allocation10_spill]] }
 0x150   : > { %820 = vmatpush.bf16.msra.mxu0 %v1457_v31 }
 0x151   : > { %v1923_v32 = vld [vmem:[#allocation2] sm:$0xff] }
 0x152   : > { %v792_v33 = vpack.c.bf16 %v1923_v32, %v1923_v32 }
 0x154   : > { %1408 = vmatmul.msk.bf16.vlgmr.msra.gmra.mxu0 %vm809_vm5, %v792_v33  ;;  %s2127_s28 = scalar_lea.vmem %s2126_s10, %s1843_s19  ;;  %s1679_s19 = smov 16  }
 0x155   : > { %v1553_v48 = vld [vmem:[%s2127_s28] ss:$0 sm:$0xff]  ;;  %983 = vmatpush.bf16.msrb.mxu0 %v1460_v13  ;;  %p1448_p1 = scmp.ne.s32.totalorder %s2134_s27, 1 }
 0x159   : > { %984 = vmatpush.bf16.msrb.mxu0 %v1459_v18 }
 0x1d1   : > { %v822_v35 = vpop.f32.mrf.mxu0 }
 0x1d2   : > { %v823_v36 = vadd.f32 %v1552_v34, %v822_v35 }
 0x1d4   : > { %v826_v37 = vpack.c.bf16 %v823_v36, %v823_v36 }
 0x1d6   : > { %888 = vrot.lane.b32.xlu1 %v826_v37, %s1674_s18  ;;  %828 = vrot.lane.b32.xlu0 %v826_v37, %s1675_s25  ;;  %s2130_s25 = sld [smem:[#allocation26_spill]] }
 0x1d9   : > { %v824_v38 = vpop.f32.mrf.mxu0 }
 0x1de   : > { %890 = vrot.lane.b32.xlu0 %v826_v37, %s1676_s16  ;;  %s2131_s16 = scalar_lea.vmem %s2130_s25, %s1846_s20 }
 0x1e6   : > { %865 = vrot.lane.b32.xlu0 %v826_v37, %s1677_s2 }
 0x1ee   : > { %925 = vrot.lane.b32.xlu0 %v826_v37, %s1678_s15 }
 0x248   : > { %v829_v39 = vpop.permute.xlu0 %828  ;;  %v889_v43 = vpop.permute.xlu1 %888 }
 0x249   : > { %v835_v40 = vsel %vm830_vm6, %v829_v39, 0 }
 0x24a   : > { %844 = vmatpush.bf16.xpose.msra.mxu1 %v835_v40  ;;  %v1462_v40 = vld [vmem:[%s1886_s3 + $0x8] sm:$0xff] }
 0x250   : > { %v891_v41 = vpop.permute.xlu0 %890 }
 0x251   : > { %1409 = vmatmul.msk.bf16.vlgmr.msra.gmra.mxu1 %vm830_vm6, %v826_v37  ;;  %v896_v42 = vsel %vm830_vm6, %v891_v41, 0  ;;  %v1461_v41 = vld [vmem:[%s1886_s3] sm:$0xff] }
 0x252   : > { %905 = vmatpush.bf16.xpose.msra.mxu3 %v896_v42  ;;  %1060 = vmatpush.bf16.msrb.mxu1 %v1462_v40 }
 0x256   : > { %1061 = vmatpush.bf16.msrb.mxu1 %v1461_v41 }
 0x258   : > { %v866_v44 = vpop.permute.xlu0 %865 }
 0x259   : > { %1411 = vmatmul.msk.bf16.vlgmr.msra.gmra.mxu3 %vm830_vm6, %v889_v43  ;;  %v872_v45 = vsel %vm870_vm7, %v866_v44, 0 }
 0x25a   : > { %881 = vmatpush.bf16.msra.mxu2 %v872_v45 }
 0x260   : > { %v926_v46 = vpop.permute.xlu0 %925 }
 0x261   : > { %v931_v47 = vsel %vm870_vm7, %v926_v46, 0 }
 0x262   : > { %940 = vmatpush.bf16.msrb.mxu2 %v931_v47 }
 0x2ce   : > { %v846_v49 = vpop.f32.mrf.mxu1 }
 0x2cf   : > { %v850_v50 = vmul.f32 0.25, %v846_v49 }
 0x2d1   : > { %v851_v51 = vadd.f32 %v1553_v48, %v850_v50 }
 0x2d3   : > { %v853_v52 = vsel %vm852_vm8, %v851_v51, -inf }
 0x2d4   : > { %854 = vmax.xlane.f32.xlu1 %v853_v52 }
 0x2d6   : > { %v848_v53 = vpop.f32.mrf.mxu1 }
 0x2dc   : > { %v907_v54 = vpop.f32.mrf.mxu3 }
 0x2dd   : > { %v911_v55 = vmul.f32 0.25, %v907_v54  ;;  %v1556_v54 = vld [vmem:[%s2131_s16] ss:$0 sm:$0xff] }
 0x2df   : > { %v912_v56 = vadd.f32 %v1553_v48, %v911_v55 }
 0x2e1   : > { %v913_v57 = vsel %vm852_vm8, %v912_v56, -inf }
 0x2e2   : > { %914 = vmax.xlane.f32.xlu2 %v913_v57 }
 0x2e4   : > { %v909_v58 = vpop.f32.mrf.mxu3 }
 0x2e5   : > { %v1466_v58 = vld [vmem:[%s1900_s29 + $0x18] sm:$0xff] }
 0x2e6   : > { %1121 = vmatpush.bf16.msrb.mxu3 %v1466_v58 }
 0x347   : > { %v855_v59 = vpop.xlane.xlu1 %854 }
 0x348   : > { %v856_v60 = vsub.f32 %v851_v51, %v855_v59  ;;  %v1555_v51 = vld [vmem:[%s2129_s0] ss:$0 sm:$0xff]  ;;  %v1465_v59 = vld [vmem:[%s1900_s29 + $0x10] sm:$0xff] }
 0x349   : > { %1122 = vmatpush.bf16.msrb.mxu3 %v1465_v59 }
 0x34a   : > { %v857_v61 = vmul.f32 1.442695, %v856_v60  ;;  %v1464_v60 = vld [vmem:[%s1900_s29 + $0x8] sm:$0xff] }
 0x34c   : > { %1561 = vpow2.f32 %v857_v61  ;;  %v1463_v61 = vld [vmem:[%s1900_s29] sm:$0xff] }
 0x34d   : > { %1123 = vmatpush.bf16.msrb.mxu3 %v1464_v60 }
 0x351   : > { %1124 = vmatpush.bf16.msrb.mxu3 %v1463_v61 }
 0x352   : > { %v1562_v62 = vpop.eup %1561 }
 0x353   : > { %v859_v63 = vsel %vm852_vm8, %v1562_v62, 0.0 }
 0x354   : > { %860 = vadd.xlane.f32.xlu2 %v859_v63 }
 0x355   : > { %v915_v0 = vpop.xlane.xlu2 %914 }
 0x356   : > { %v916_v1 = vsub.f32 %v912_v56, %v915_v0 }
 0x358   : > { %v917_v2 = vmul.f32 1.442695, %v916_v1 }
 0x35a   : > { %1563 = vpow2.f32 %v917_v2 }
 0x360   : > { %v1564_v3 = vpop.eup %1563 }
 0x361   : > { %v919_v4 = vsel %vm852_vm8, %v1564_v3, 0.0 }
 0x362   : > { %920 = vadd.xlane.f32.xlu2 %v919_v4 }
 0x3c7   : > { %v861_v5 = vpop.xlane.xlu2 %860 }
 0x3c8   : > { %1565 = vrcp.f32 %v861_v5 }
 0x3ce   : > { %v1566_v6 = vpop.eup %1565 }
 0x3cf   : > { %v863_v7 = vmul.f32 %v1566_v6, %v1562_v62  ;;  %v1557_v62 = vld [vmem:[%s720_s24] ss:$0 sm:$0xff] }
 0x3d1   : > { %v864_v8 = vpack.c.bf16 %v863_v7, %v863_v7 }
 0x3d3   : > { %1410 = vmatmul.msk.bf16.vlgmr.msra.gmra.mxu2 %vm852_vm8, %v864_v8 }
 0x3d5   : > { %v921_v9 = vpop.xlane.xlu2 %920 }
 0x3d6   : > { %1567 = vrcp.f32 %v921_v9 }
 0x3d7   : > { %1569 = vrcp.f32 %v1680_v28 }
 0x3dc   : > { %v1568_v10 = vpop.eup %1567 }
 0x3dd   : > { %v923_v11 = vmul.f32 %v1568_v10, %v1564_v3  ;;  %v1570_v29 = vpop.eup %1569 }
 0x3de   : > { %v997_v30 = vmul.f32 32.0, %v1570_v29  ;;  %vm1001_vm10 = vweird.f32 %v1570_v29 }
 0x3df   : > { %v924_v12 = vpack.c.bf16 %v923_v11, %v923_v11 }
 0x3e0   : > { %v998_v31 = vsub.f32 1.0, %v997_v30 }
 0x3e2   : > { %v999_v33 = vmul.f32 %v1570_v29, %v998_v31 }
 0x3e3   : > { %1412 = vmatmul.msk.bf16.vlgmr.msrb.gmra.mxu2 %vm852_vm8, %v924_v12  ;;  %v1558_v12 = vld [vmem:[%s728_s23] ss:$0 sm:$0xff] }
 0x3e4   : > { %v1000_v34 = vadd.f32 %v1570_v29, %v999_v33  ;;  %v1559_v33 = vld [vmem:[%s731_s1] ss:$0 sm:$0xff] }
 0x3e6   : > { %v1959_v35 = vsel %vm1001_vm10, %v1570_v29, %v1000_v34 }
 0x456   : > { %v883_v14 = vpop.f32.mrf.mxu2 }
 0x457   : > { %887 = vst.msk [vmem:[#allocation3] sm:$0xff] %vm830_vm6, %v883_v14 }
 0x45e   : > { %v885_v15 = vpop.f32.mrf.mxu2 }
 0x466   : > { %v942_v16 = vpop.f32.mrf.mxu2 }
 0x467   : > { %947 = vrot.lane.b32.xlu2 %v942_v16, %s1679_s19 }
 0x46e   : > { %v944_v17 = vpop.f32.mrf.mxu2 }
 0x4c1   : > { %v948_v19 = vpop.permute.xlu2 %947 }
 0x4c2   : > { %951 = vst.msk [vmem:[#allocation3] sm:$0xff] %vm950_vm9, %v948_v19 }
 0x4c9   : > { %v952_v20 = vld [vmem:[#allocation3] sm:$0xff] }
 0x4ca   : > { %v957_v21 = vpack.c.bf16 %v952_v20, %v952_v20 }
 0x4cc   : > { %1421 = vmatmul.msk.bf16.vlgmr.msrb.gmra.mxu0 %vm809_vm5, %v957_v21 }
 0x549   : > { %v986_v23 = vpop.f32.mrf.mxu0 }
 0x54a   : > { %v987_v24 = vadd.f32 %v1554_v22, %v986_v23 }
 0x54c   : > { %v990_v25 = vadd.f32 %v987_v24, %v1923_v32 }
 0x54e   : > { %v993_v26 = vsel %vm809_vm5, %v990_v25, 0.0 }
 0x54f   : > { %994 = vadd.xlane.f32.xlu0 %v993_v26 }
 0x551   : > { %v988_v27 = vpop.f32.mrf.mxu0 }
 0x5c2   : > { %v995_v36 = vpop.xlane.xlu0 %994 }
 0x5c3   : > { %v1003_v37 = vmul.f32 %v1959_v35, %v995_v36 }
 0x5c5   : > { %v1004_v32 = vsub.f32 %v990_v25, %v1003_v37 }
 0x5c7   : > { %v1005_v38 = vmul.f32 %v1004_v32, %v1004_v32 }
 0x5c9   : > { %v1006_v39 = vsel %vm809_vm5, %v1005_v38, 0.0 }
 0x5ca   : > { %1007 = vadd.xlane.f32.xlu2 %v1006_v39 }
 0x63d   : > { %v1008_v42 = vpop.xlane.xlu2 %1007 }
 0x63e   : > { %v1009_v43 = vmul.f32 %v1008_v42, %v1959_v35 }
 0x640   : > { %v1010_v44 = vadd.f32 1e-12, %v1009_v43 }
 0x642   : > { %1571 = vrsqrt.f32 %v1010_v44  ;;  %vm1017_vm12 = vweird.f32 %v1010_v44 }
 0x648   : > { %v1572_v45 = vpop.eup %1571 }
 0x649   : > { %v1012_v46 = vmul.f32 %v1572_v45, %v1010_v44  ;;  %vm1018_vm11 = vweird.f32 %v1572_v45 }
 0x64a   : > { %vm1019_vm13 = vmor %vm1017_vm12, %vm1018_vm11 }
 0x64b   : > { %v1013_v47 = vmul.f32 %v1572_v45, %v1012_v46 }
 0x64d   : > { %v1014_v48 = vmul.f32 0.5, %v1013_v47 }
 0x64f   : > { %v1015_v49 = vsub.f32 1.5, %v1014_v48 }
 0x651   : > { %v1016_v50 = vmul.f32 %v1572_v45, %v1015_v49 }
 0x653   : > { %v1020_v52 = vsel %vm1019_vm13, %v1572_v45, %v1016_v50 }
 0x654   : > { %v1021_v53 = vmul.f32 %v1020_v52, %v1004_v32 }
 0x656   : > { %v1025_v55 = vmul.f32 %v1555_v51, %v1021_v53 }
 0x658   : > { %v1029_v56 = vadd.f32 %v1556_v54, %v1025_v55 }
 0x65a   : > { %v1034_v57 = vpack.c.bf16 %v1029_v56, %v1029_v56 }
 0x65c   : > { %1430 = vmatmul.msk.bf16.vlgmr.msrb.gmra.mxu1 %vm809_vm5, %v1034_v57 }
 0x6d9   : > { %v1063_v63 = vpop.f32.mrf.mxu1 }
 0x6da   : > { %v1064_v0 = vadd.f32 %v1557_v62, %v1063_v63 }
 0x6dc   : > { %v1068_v1 = vmul.f32 0.044715, %v1064_v0  ;;  %v1067_v8 = vmul.f32 0.5, %v1064_v0 }
 0x6de   : > { %v1069_v2 = vmul.f32 %v1068_v1, %v1064_v0 }
 0x6e0   : > { %v1070_v3 = vmul.f32 %v1069_v2, %v1064_v0 }
 0x6e1   : > { %v1065_v4 = vpop.f32.mrf.mxu1 }
 0x6e2   : > { %v1071_v5 = vadd.f32 %v1070_v3, %v1064_v0 }
 0x6e4   : > { %v1072_v6 = vmul.f32 0.7978846, %v1071_v5 }
 0x6e6   : > { %1573 = vtanh.f32 %v1072_v6 }
 0x6ec   : > { %v1574_v7 = vpop.eup %1573 }
 0x6ed   : > { %v1074_v9 = vadd.f32 1.0, %v1574_v7 }
 0x6ef   : > { %v1075_v10 = vmul.f32 %v1074_v9, %v1067_v8 }
 0x6f1   : > { %v1084_v11 = vpack.c.bf16 %v1075_v10, %v1075_v10 }
 0x6f3   : > { %1447 = vmatmul.msk.bf16.vlgmr.msrb.gmra.mxu3 %vm1113_vm14, %v1084_v11 }
 0x776   : > { %v1126_v13 = vpop.f32.mrf.mxu3 }
 0x777   : > { %v1127_v14 = vadd.f32 %v1558_v12, %v1126_v13 }
 0x779   : > { %v1130_v15 = vadd.f32 %v1127_v14, %v1029_v56 }
 0x77b   : > { %v1133_v16 = vsel %vm809_vm5, %v1130_v15, 0.0 }
 0x77c   : > { %1134 = vadd.xlane.f32.xlu1 %v1133_v16 }
 0x77e   : > { %v1128_v17 = vpop.f32.mrf.mxu3 }
 0x7ef   : > { %v1135_v18 = vpop.xlane.xlu1 %1134 }
 0x7f0   : > { %v1136_v19 = vmul.f32 %v1135_v18, %v1959_v35 }
 0x7f2   : > { %v1137_v20 = vsub.f32 %v1130_v15, %v1136_v19 }
 0x7f4   : > { %v1138_v21 = vmul.f32 %v1137_v20, %v1137_v20 }
 0x7f6   : > { %v1139_v22 = vsel %vm809_vm5, %v1138_v21, 0.0 }
 0x7f7   : > { %1140 = vadd.xlane.f32.xlu1 %v1139_v22 }
 0x86a   : > { %v1141_v23 = vpop.xlane.xlu1 %1140 }
 0x86b   : > { %v1142_v24 = vmul.f32 %v1141_v23, %v1959_v35  ;;  %v1560_v35 = vld [vmem:[%s734_s9] ss:$0 sm:$0xff] }
 0x86d   : > { %v1143_v25 = vadd.f32 1e-12, %v1142_v24 }
 0x86f   : > { %1575 = vrsqrt.f32 %v1143_v25  ;;  %vm1150_vm0 = vweird.f32 %v1143_v25 }
 0x875   : > { %v1576_v26 = vpop.eup %1575 }
 0x876   : > { %v1145_v27 = vmul.f32 %v1576_v26, %v1143_v25  ;;  %vm1151_vm15 = vweird.f32 %v1576_v26 }
 0x877   : > { %vm1152_vm1 = vmor %vm1150_vm0, %vm1151_vm15 }
 0x878   : > { %v1146_v28 = vmul.f32 %v1576_v26, %v1145_v27 }
 0x87a   : > { %v1147_v29 = vmul.f32 0.5, %v1146_v28 }
 0x87c   : > { %v1148_v30 = vsub.f32 1.5, %v1147_v29 }
 0x87e   : > { %v1149_v31 = vmul.f32 %v1576_v26, %v1148_v30 }
 0x880   : > { %v1153_v34 = vsel %vm1152_vm1, %v1576_v26, %v1149_v31 }
 0x881   : > { %v1154_v36 = vmul.f32 %v1153_v34, %v1137_v20 }
 0x883   : > { %v1158_v37 = vmul.f32 %v1559_v33, %v1154_v36  ;;  %1167 = sbr.rel (%p1448_p1) target bundleno = 2185 (0x889), region = 92 }
 0x885   : > { %v1162_v32 = vadd.f32 %v1560_v35, %v1158_v37 }
 0x887   : > { %1163 = vst.msk [vmem:[#allocation2] sm:$0xff] %vm809_vm5, %v1162_v32 }
 0x888   : > { %1168 = vst.msk [vmem:[%s683_s14] sm:$0xff] %vm809_vm5, %v1162_v32 }
 0x889 PF: > { %s2135_s1 = sld [smem:[#allocation11_spill]]  ;;  %s1182_s22 = sshll.u32 %s683_s14, 4  ;;  %s1183_s22 = int_to_ptr.vmem [resolvable:$true] %s1182_s22 }
 0x88a   : > { %s2136_s30 = sld [smem:[#allocation8_spill]] }
 0x88b   : > { %s2138_s3 = sld [smem:[#allocation30_spill]] }
 0x88f   : > { %s1450_s17 = sshll.u32 %s2135_s1, 3 }
 0x890   : > { %s2139_s25 = sand.u32 1, %s2136_s30  }
 0x891   : > { %s1180_s0 = scalar_lea.hbm %s2138_s3, %s1450_s17  ;;  %s1170_s16 = scalar_lea.sflag [#allocation5], %s2139_s25 }
 0x892   : > { %s1184_s18 = sshll.u32 %s1180_s0, 4  ;;  %s1597_s24 = scalar_lea.hbm %s2138_s3, 16  ;;  %s1185_s18 = int_to_ptr.hbm [resolvable:$true] %s1184_s18 }
 0x893   : > { %s1591_s2 = sshra.s32 %s1185_s18, 4  ;;  %s1592_s2 = int_to_ptr.hbm [resolvable:$true] %s1591_s2 }
 0x894   : > { %s1593_s15 = scalar_lea.hbm %s1592_s2, 8  ;;  %p1598_p6 = scmp.lt.s32.totalorder %s1592_s2, %s2138_s3 }
 0x895   : > { %p1594_p2 = scmp.ne.s32.totalorder %s1592_s2, %s1593_s15  ;;  %p1599_p7 = scmp.lt.s32.totalorder %s1597_s24, %s1593_s15 }
 0x897   : > { %p1595_p4 = pnand %p1594_p2, %p1815_p3  ;;  %p1600_p8 = por %p1599_p7, %p1598_p6 }
 0x899   : > { %p1596_p5 = pneg %p1595_p4 }
 0x89b   : > { %p1601_p10 = pnand %p1600_p8, %p1596_p5 }
 0x89d   : > { %1604 = shalt.err (!%p1601_p10)
}
 0x89e   : > { %1467 = dma.vmem_to_hbm [thread:$0]  (%p1815_p3), %s1183_s22, 128, %s1185_s18, %s1170_s16  }
 0x89f PF: > { %s2140_s26 = sld [smem:[#allocation14_spill]] }
 0x8a0   : > { %s2141_s14 = sld [smem:[#allocation7_spill]] }
 0x8a5   : > { %p1473_p11 = scmp.ge.s32.totalorder %s2140_s26, 2 }
 0x8a6   : > { %s1196_s28 = sand.u32 1, %s2141_s14  }
 0x8a7   : > { %p1470_p12 = pnand %p1473_p11, %p1825_p9  ;;  %s1197_s19 = scalar_lea.sflag [#allocation5], %s1196_s28 }
 0x8a9   : > { %p1471_p13 = pneg %p1470_p12 }
 0x8ab   : > { %1638 = dma.done.wait (%p1471_p13), %s1197_s19, 128  }
 0x8ac   : > { %1640 = vsyncadd (%p1471_p13), %s1197_s19, 4294967168  ;;  %s29_s28 = sadd.s32 1, %s2140_s26   ;;  %s2143_s21 = sld [smem:[#allocation8_spill]] }
 0x8ad   : > { %p26_p0 = scmp.ge.s32.totalorder %s29_s28, 6   ;;  %s2144_s22 = sld [smem:[#allocation9_spill]] }
 0x8ae   : > { %s2145_s23 = sld [smem:[#allocation19_spill]] }
 0x8af   : > { %s2146_s24 = sld [smem:[#allocation12_spill]]  ;;  %28 = sbr.rel (!%p26_p0) target bundleno = 17 (0x11), region = 166 }
 0x8b0   : > { %s2147_s25 = sld [smem:[#allocation13_spill]] }
 0x8b1   : > { %s2148_s26 = sld [smem:[#allocation15_spill]] }
 0x8b2   : > { %s2149_s27 = sld [smem:[#allocation17_spill]] }
 0x8b4   :  { %1203 = vsyncpa [#allocation5], 1 }
 0x8b5   :  { %1205 = vsyncpa [#allocation5 + $0x1], 1 }

</bundles_post_ra>
